<compile_context>
chip_gen: v7x
topology: tpu7x:2x2x1
jax: 0.10.0
libtpu: 0.0.40
codegen_flags: <defaults>
</compile_context>

<pallas_src>
import functools

import jax
import jax.numpy as jnp
from jax.experimental import pallas as pl
from jax.experimental.pallas import tpu as pltpu


def _round_up(x, m):
    return ((x + m - 1) // m) * m


def _leaky_relu(x, slope=0.2):
    return jnp.where(x > 0, x, slope * x)


# -----------------------------------------------------------------------------
# Single fused kernel: encoder (2 GIN layers) -> pool/BN/fc/fc_mu -> decoder MLP
# -> hard Gumbel-softmax edges -> symmetric flattened adjacency.
# -----------------------------------------------------------------------------
def _vae_fused_kernel(x_ref, a_ref, p_ref, w1_0_ref, wenc_ref, muw_ref, encv_ref,
                      dw0_ref, dw1_ref, dw2_ref, decv_ref, gum_ref, place_ref,
                      out_ref, *, H, L, Hd, E_pad):
    f32 = jnp.float32
    bf16 = jnp.bfloat16

    x = x_ref[...]            # (B*N, F)   bf16, batch stacked into sublanes
    a = a_ref[...]            # (B*N, B*N) bf16, block-diagonal adjacency
    encv = encv_ref[...]      # (16, H)    f32 packed H-wide vectors
    decv = decv_ref[...]      # (8, DV)    f32 packed decoder-side vectors

    # ---- GIN layer 0: agg = A@x + x ; MLP = Lin -> LReLU -> BN(eval) -> Lin -> LReLU
    agg = jnp.dot(a, x, preferred_element_type=f32) + x.astype(f32)
    h = jnp.dot(agg.astype(bf16), w1_0_ref[...], preferred_element_type=f32) + encv[0:1]
    h = _leaky_relu(h)
    h = h * encv[1:2] + encv[2:3]
    h = jnp.dot(h.astype(bf16), wenc_ref[0:H, :], preferred_element_type=f32) + encv[3:4]
    h = _leaky_relu(h)

    # ---- GIN layer 1
    agg = jnp.dot(a, h.astype(bf16), preferred_element_type=f32) + h
    h = jnp.dot(agg.astype(bf16), wenc_ref[H:2 * H, :], preferred_element_type=f32) + encv[4:5]
    h = _leaky_relu(h)
    h = h * encv[5:6] + encv[6:7]
    h = jnp.dot(h.astype(bf16), wenc_ref[2 * H:3 * H, :], preferred_element_type=f32) + encv[7:8]
    h = _leaky_relu(h)

    # ---- global_add_pool (node mask baked into P) + BN(eval) + fc + fc_mu
    # Padded nodes never influence real rows (block-diag A has zero rows/cols for them)
    # and P has zeros for them, so no explicit per-layer masking is needed.
    pooled = jnp.dot(p_ref[...], h.astype(bf16), preferred_element_type=f32)     # (B, H)
    g = pooled * encv[8:9] + encv[9:10]
    g = jnp.dot(g.astype(bf16), wenc_ref[3 * H:4 * H, :], preferred_element_type=f32) + encv[10:11]
    mu = jnp.dot(g.astype(bf16), muw_ref[...], preferred_element_type=f32) + decv[0:1, :L]
    # TODO(synk): training-mode reparameterize (mu + eps*exp(0.5*logvar)) and fc_logvar
    # are omitted; in eval mode reparameterize returns mu and logvar never affects output.
    z = mu

    # ---- Decoder MLP (n_layers_dec = 3) + hard Gumbel-softmax (tau=1), class 0 = edge
    d = jnp.dot(z.astype(bf16), dw0_ref[...], preferred_element_type=f32) + decv[1:2, :Hd]
    d = jnp.maximum(d, 0.0)
    d = jnp.dot(d.astype(bf16), dw1_ref[...], preferred_element_type=f32) + decv[2:3, :Hd]
    d = jnp.maximum(d, 0.0)
    # one matmul on (w2_class0 - w2_class1); argmax==0  <=>  diff + (g0 - g1) >= 0
    diff = jnp.dot(d.astype(bf16), dw2_ref[...], preferred_element_type=f32) + decv[3:4, :E_pad]
    edges = jnp.where(diff + gum_ref[...] >= 0.0, 1.0, 0.0).astype(bf16)         # (B, E_pad)

    # ---- symmetric flattened adjacency via constant 0/1 placement matrix (lane-dense)
    out_ref[...] = jnp.dot(edges, place_ref[...], preferred_element_type=f32)    # (B, NN_pad)


# -----------------------------------------------------------------------------
# Parameter init (deterministic; shapes follow the PyTorch __init__)
# -----------------------------------------------------------------------------
def init_params(key, input_dim, hidden_dim_enc, hidden_dim_dec, latent_dim,
                n_layers_enc, n_max_nodes):
    keys = list(jax.random.split(key, 32))

    def lin(k, din, dout):
        kw, kb = jax.random.split(k)
        w = jax.random.normal(kw, (din, dout), jnp.float32) * 0.1
        b = jax.random.normal(kb, (1, dout), jnp.float32) * 0.1
        return w, b

    def bn_affine(d):
        gamma = jnp.ones((1, d), jnp.float32)
        beta = jnp.zeros((1, d), jnp.float32)
        rm = jnp.zeros((1, d), jnp.float32)
        rv = jnp.ones((1, d), jnp.float32)
        scale = gamma / jnp.sqrt(rv + 1e-5)
        shift = beta - rm * scale
        return scale, shift

    p = {"enc": []}
    din = input_dim
    for _ in range(n_layers_enc):
        w1, b1 = lin(keys.pop(), din, hidden_dim_enc)
        w2, b2 = lin(keys.pop(), hidden_dim_enc, hidden_dim_enc)
        s, t = bn_affine(hidden_dim_enc)
        p["enc"].append(dict(w1=w1, b1=b1, bn_scale=s, bn_shift=t, w2=w2, b2=b2))
        din = hidden_dim_enc

    p["gin_bn_scale"], p["gin_bn_shift"] = bn_affine(hidden_dim_enc)
    p["fc_w"], p["fc_b"] = lin(keys.pop(), hidden_dim_enc, hidden_dim_enc)
    p["mu_w"], p["mu_b"] = lin(keys.pop(), hidden_dim_enc, latent_dim)
    p["lv_w"], p["lv_b"] = lin(keys.pop(), hidden_dim_enc, latent_dim)  # unused in eval forward

    E = n_max_nodes * (n_max_nodes - 1) // 2
    p["dec_w0"], p["dec_b0"] = lin(keys.pop(), latent_dim, hidden_dim_dec)
    p["dec_w1"], p["dec_b1"] = lin(keys.pop(), hidden_dim_dec, hidden_dim_dec)
    w2, b2 = lin(keys.pop(), hidden_dim_dec, 2 * E)
    p["dec_w2a"], p["dec_b2a"] = w2[:, 0::2], b2[:, 0::2]   # class-0 (edge) columns
    p["dec_w2b"], p["dec_b2b"] = w2[:, 1::2], b2[:, 1::2]   # class-1 (no-edge) columns
    return p


# -----------------------------------------------------------------------------
# Pack parameters into the kernel's fused / bf16 / lane-padded layout (done once)
# -----------------------------------------------------------------------------
def pack_params(p, n_max_nodes):
    bf16 = jnp.bfloat16
    H = p["fc_w"].shape[0]
    L = p["mu_w"].shape[1]
    Hd = p["dec_w0"].shape[1]
    E = n_max_nodes * (n_max_nodes - 1) // 2
    E_pad = _round_up(E, 128)
    NN = n_max_nodes * n_max_nodes
    NN_pad = _round_up(NN, 128)
    DV = max(128, L, Hd, E_pad)

    assert len(p["enc"]) == 2, "fused kernel is specialized to n_layers_enc = 2"

    # packed H-wide vectors: rows 0-3 layer0 [b1,scale,shift,b2], 4-7 layer1,
    # 8 gin_bn_scale, 9 gin_bn_shift, 10 fc_b, 11-15 zero.
    encv = jnp.zeros((16, H), jnp.float32)
    for li, layer in enumerate(p["enc"]):
        encv = encv.at[4 * li + 0].set(layer["b1"][0])
        encv = encv.at[4 * li + 1].set(layer["bn_scale"][0])
        encv = encv.at[4 * li + 2].set(layer["bn_shift"][0])
        encv = encv.at[4 * li + 3].set(layer["b2"][0])
    encv = encv.at[8].set(p["gin_bn_scale"][0])
    encv = encv.at[9].set(p["gin_bn_shift"][0])
    encv = encv.at[10].set(p["fc_b"][0])

    # all (H,H) encoder-side weights stacked into one (4H, H) bf16 slab
    wenc = jnp.concatenate([p["enc"][0]["w2"], p["enc"][1]["w1"],
                            p["enc"][1]["w2"], p["fc_w"]], axis=0).astype(bf16)

    # packed decoder-side vectors: row0 mu_b, row1 dec_b0, row2 dec_b1, row3 (b2a-b2b)
    decv = jnp.zeros((8, DV), jnp.float32)
    decv = decv.at[0, :L].set(p["mu_b"][0])
    decv = decv.at[1, :Hd].set(p["dec_b0"][0])
    decv = decv.at[2, :Hd].set(p["dec_b1"][0])
    decv = decv.at[3, :E].set((p["dec_b2a"] - p["dec_b2b"])[0])

    # class-logit difference weight, lane-padded to E_pad
    dw2d = jnp.zeros((Hd, E_pad), jnp.float32).at[:, :E].set(p["dec_w2a"] - p["dec_w2b"])

    # constant placement matrix: row e has 1.0 at (i*N+j) and (j*N+i) for upper-tri e=(i,j);
    # padded rows/cols stay zero, so padded edge lanes and padded output lanes are inert.
    iu_r, iu_c = jnp.triu_indices(n_max_nodes, k=1)
    rows = jnp.arange(E)
    place = jnp.zeros((E_pad, NN_pad), jnp.float32)
    place = place.at[rows, iu_r * n_max_nodes + iu_c].set(1.0)
    place = place.at[rows, iu_c * n_max_nodes + iu_r].set(1.0)

    return dict(
        dims=dict(H=H, L=L, Hd=Hd, E=E, E_pad=E_pad, NN=NN, NN_pad=NN_pad),
        w1_0=p["enc"][0]["w1"].astype(bf16),
        wenc=wenc,
        muw=p["mu_w"].astype(bf16),
        encv=encv,
        dw0=p["dec_w0"].astype(bf16),
        dw1=p["dec_w1"].astype(bf16),
        dw2d=dw2d.astype(bf16),
        decv=decv,
        place=place.astype(bf16),
    )


# -----------------------------------------------------------------------------
# Full forward: one fused pallas_call
# -----------------------------------------------------------------------------
def vae_forward(packed, x, A, mask, key, n_max_nodes):
    dims = packed["dims"]
    H, L, Hd = dims["H"], dims["L"], dims["Hd"]
    E, E_pad, NN, NN_pad = dims["E"], dims["E_pad"], dims["NN"], dims["NN_pad"]
    B, N, F = x.shape
    BN = B * N
    bf16, f32 = jnp.bfloat16, jnp.float32

    # stack batch into sublanes; block-diagonal adjacency; masked pooling matrix
    x_st = x.reshape(BN, F).astype(bf16)
    eyeB = jnp.eye(B, dtype=f32)
    a_bd = (eyeB[:, :, None, None] * A[:, None, :, :]).transpose(0, 2, 1, 3)
    a_bd = a_bd.reshape(BN, BN).astype(bf16)
    p_pool = (eyeB[:, :, None] * mask[None, :, :]).reshape(B, BN).astype(bf16)

    # pre-drawn Gumbel-noise difference (g0 - g1), zero-padded to E_pad lanes
    g = jax.random.gumbel(key, (B, E, 2), f32)
    gumd = jnp.zeros((B, E_pad), f32).at[:, :E].set(g[..., 0] - g[..., 1])

    args = (x_st, a_bd, p_pool, packed["w1_0"], packed["wenc"], packed["muw"],
            packed["encv"], packed["dw0"], packed["dw1"], packed["dw2d"],
            packed["decv"], gumd, packed["place"])

    flops = 2 * (BN * BN * F + BN * F * H + BN * H * H        # GIN layer 0
                 + BN * BN * H + 2 * BN * H * H               # GIN layer 1
                 + B * BN * H + B * H * H + B * H * L         # pool / fc / fc_mu
                 + B * L * Hd + B * Hd * Hd + B * Hd * E_pad  # decoder MLP
                 + B * E_pad * NN_pad)                        # adjacency placement
    bytes_accessed = sum(int(a.size) * a.dtype.itemsize for a in args) + B * NN_pad * 4

    def full_spec(shape):
        n = len(shape)
        return pl.BlockSpec(shape, lambda i: (0,) * n)

    out = pl.pallas_call(
        functools.partial(_vae_fused_kernel, H=H, L=L, Hd=Hd, E_pad=E_pad),
        out_shape=jax.ShapeDtypeStruct((B, NN_pad), f32),
        grid=(1,),
        in_specs=[full_spec(a.shape) for a in args],
        out_specs=full_spec((B, NN_pad)),
        compiler_params=pltpu.CompilerParams(dimension_semantics=("arbitrary",)),
        cost_estimate=pl.CostEstimate(flops=flops, transcendentals=0,
                                      bytes_accessed=bytes_accessed),
    )(*args)

    adj = out[:, :NN].reshape(B, N, N)   # contiguous row-major reshape; no data movement
    return adj


if __name__ == "__main__":
    key = jax.random.PRNGKey(0)
    kA, kx, kp, kg = jax.random.split(key, 4)

    B = 2
    N = 8            # n_max_nodes
    F = 4            # input_dim (node features)
    H_ENC = 32       # hidden_dim_enc
    H_DEC = 32       # hidden_dim_dec
    LATENT = 16      # latent_dim
    N_LAYERS_ENC = 2
    # n_layers_dec = 3 (fixed by the fused kernel structure)

    # node mask: graph 0 has 8 nodes, graph 1 has 6 nodes
    n_nodes = jnp.array([8, 6])
    mask = (jnp.arange(N)[None, :] < n_nodes[:, None]).astype(jnp.float32)  # (B, N)

    # random symmetric adjacency, zero diagonal, zeroed for padded nodes
    up = jax.random.bernoulli(kA, 0.4, (B, N, N)).astype(jnp.float32)
    up = jnp.triu(up, k=1)
    A = up + jnp.transpose(up, (0, 2, 1))
    A = A * mask[:, :, None] * mask[:, None, :]

    x = jax.random.normal(kx, (B, N, F), jnp.float32) * mask[:, :, None]

    params = init_params(kp, F, H_ENC, H_DEC, LATENT, N_LAYERS_ENC, N)
    packed = pack_params(params, N)

    adj = vae_forward(packed, x, A, mask, kg, N)
    adj = jax.block_until_ready(adj)

    assert adj.shape == (B, N, N)
    assert bool(jnp.all(adj == jnp.transpose(adj, (0, 2, 1))))        # symmetric
    assert bool(jnp.all(jnp.diagonal(adj, axis1=1, axis2=2) == 0.0))  # zero diagonal
    assert bool(jnp.all((adj == 0.0) | (adj == 1.0)))                 # hard 0/1 edges
    print("KERNEL_OK")
</pallas_src>

<mosaic_0001>
module attributes {stable_mosaic.version = 11 : i64} {
  func.func @_vae_fused_kernel(%arg0: i32, %arg1: memref<16x4xbf16, #tpu.memory_space<vmem>>, %arg2: memref<16x16xbf16, #tpu.memory_space<vmem>>, %arg3: memref<2x16xbf16, #tpu.memory_space<vmem>>, %arg4: memref<4x32xbf16, #tpu.memory_space<vmem>>, %arg5: memref<128x32xbf16, #tpu.memory_space<vmem>>, %arg6: memref<32x16xbf16, #tpu.memory_space<vmem>>, %arg7: memref<16x32xf32, #tpu.memory_space<vmem>>, %arg8: memref<16x32xbf16, #tpu.memory_space<vmem>>, %arg9: memref<32x32xbf16, #tpu.memory_space<vmem>>, %arg10: memref<32x128xbf16, #tpu.memory_space<vmem>>, %arg11: memref<8x128xf32, #tpu.memory_space<vmem>>, %arg12: memref<2x128xf32, #tpu.memory_space<vmem>>, %arg13: memref<128x128xbf16, #tpu.memory_space<vmem>>, %arg14: memref<2x128xf32, #tpu.memory_space<vmem>>) attributes {dimension_semantics = [#tpu.dimension_semantics<arbitrary>], iteration_bounds = array<i64: 1>, scalar_prefetch = 0 : i64, scratch_operands = 0 : i64, tpu.core_type = #tpu.core_type<tc>, window_params = [{pipeline_mode = #tpu.pipeline_mode<synchronous>, transform_indices = @transform_0, window_bounds = array<i64: 16, 4>}, {pipeline_mode = #tpu.pipeline_mode<synchronous>, transform_indices = @transform_1, window_bounds = array<i64: 16, 16>}, {pipeline_mode = #tpu.pipeline_mode<synchronous>, transform_indices = @transform_2, window_bounds = array<i64: 2, 16>}, {pipeline_mode = #tpu.pipeline_mode<synchronous>, transform_indices = @transform_3, window_bounds = array<i64: 4, 32>}, {pipeline_mode = #tpu.pipeline_mode<synchronous>, transform_indices = @transform_4, window_bounds = array<i64: 128, 32>}, {pipeline_mode = #tpu.pipeline_mode<synchronous>, transform_indices = @transform_5, window_bounds = array<i64: 32, 16>}, {pipeline_mode = #tpu.pipeline_mode<synchronous>, transform_indices = @transform_6, window_bounds = array<i64: 16, 32>}, {pipeline_mode = #tpu.pipeline_mode<synchronous>, transform_indices = @transform_7, window_bounds = array<i64: 16, 32>}, {pipeline_mode = #tpu.pipeline_mode<synchronous>, transform_indices = @transform_8, window_bounds = array<i64: 32, 32>}, {pipeline_mode = #tpu.pipeline_mode<synchronous>, transform_indices = @transform_9, window_bounds = array<i64: 32, 128>}, {pipeline_mode = #tpu.pipeline_mode<synchronous>, transform_indices = @transform_10, window_bounds = array<i64: 8, 128>}, {pipeline_mode = #tpu.pipeline_mode<synchronous>, transform_indices = @transform_11, window_bounds = array<i64: 2, 128>}, {pipeline_mode = #tpu.pipeline_mode<synchronous>, transform_indices = @transform_12, window_bounds = array<i64: 128, 128>}, {pipeline_mode = #tpu.pipeline_mode<synchronous>, transform_indices = @transform_13, window_bounds = array<i64: 2, 128>}]} {
    %c0 = arith.constant 0 : index
    %c0_0 = arith.constant 0 : index
    %0 = vector.load %arg1[%c0, %c0_0] : memref<16x4xbf16, #tpu.memory_space<vmem>>, vector<16x4xbf16>
    %c0_1 = arith.constant 0 : index
    %c0_2 = arith.constant 0 : index
    %1 = vector.load %arg2[%c0_1, %c0_2] : memref<16x16xbf16, #tpu.memory_space<vmem>>, vector<16x16xbf16>
    %c0_3 = arith.constant 0 : index
    %c0_4 = arith.constant 0 : index
    %2 = vector.load %arg7[%c0_3, %c0_4] : memref<16x32xf32, #tpu.memory_space<vmem>>, vector<16x32xf32>
    %c0_5 = arith.constant 0 : index
    %c0_6 = arith.constant 0 : index
    %3 = vector.load %arg11[%c0_5, %c0_6] : memref<8x128xf32, #tpu.memory_space<vmem>>, vector<8x128xf32>
    %cst = arith.constant dense<0.000000e+00> : vector<16x4xf32>
    %4 = tpu.matmul %1, %0, %cst {dimension_numbers = #tpu.dot_dimension_numbers<[1], [0], [0], [1], [0, 0, 1, 1], [], []>} : vector<16x16xbf16>, vector<16x4xbf16>, vector<16x4xf32> -> vector<16x4xf32>
    %5 = arith.extf %0 : vector<16x4xbf16> to vector<16x4xf32>
    %6 = arith.addf %4, %5 : vector<16x4xf32>
    %7 = arith.truncf %6 : vector<16x4xf32> to vector<16x4xbf16>
    %c0_7 = arith.constant 0 : index
    %c0_8 = arith.constant 0 : index
    %8 = vector.load %arg4[%c0_7, %c0_8] : memref<4x32xbf16, #tpu.memory_space<vmem>>, vector<4x32xbf16>
    %cst_9 = arith.constant dense<0.000000e+00> : vector<16x32xf32>
    %9 = tpu.matmul %7, %8, %cst_9 {dimension_numbers = #tpu.dot_dimension_numbers<[1], [0], [0], [1], [0, 0, 1, 1], [], []>} : vector<16x4xbf16>, vector<4x32xbf16>, vector<16x32xf32> -> vector<16x32xf32>
    %10 = vector.extract_strided_slice %2 {offsets = [0, 0], sizes = [1, 32], strides = [1, 1]} : vector<16x32xf32> to vector<1x32xf32>
    %11 = vector.broadcast %10 : vector<1x32xf32> to vector<16x32xf32>
    %12 = arith.addf %9, %11 : vector<16x32xf32>
    %cst_10 = arith.constant 0.000000e+00 : f32
    %13 = vector.broadcast %cst_10 : f32 to vector<16x32xf32>
    %14 = arith.cmpf ogt, %12, %13 : vector<16x32xf32>
    %cst_11 = arith.constant 2.000000e-01 : f32
    %15 = vector.broadcast %cst_11 : f32 to vector<16x32xf32>
    %16 = arith.mulf %15, %12 : vector<16x32xf32>
    %17 = arith.select %14, %12, %16 : vector<16x32xi1>, vector<16x32xf32>
    %18 = vector.extract_strided_slice %2 {offsets = [1, 0], sizes = [1, 32], strides = [1, 1]} : vector<16x32xf32> to vector<1x32xf32>
    %19 = vector.broadcast %18 : vector<1x32xf32> to vector<16x32xf32>
    %20 = arith.mulf %17, %19 : vector<16x32xf32>
    %21 = vector.extract_strided_slice %2 {offsets = [2, 0], sizes = [1, 32], strides = [1, 1]} : vector<16x32xf32> to vector<1x32xf32>
    %22 = vector.broadcast %21 : vector<1x32xf32> to vector<16x32xf32>
    %23 = arith.addf %20, %22 : vector<16x32xf32>
    %24 = arith.truncf %23 : vector<16x32xf32> to vector<16x32xbf16>
    %c0_12 = arith.constant 0 : index
    %c0_13 = arith.constant 0 : index
    %25 = vector.load %arg5[%c0_12, %c0_13] : memref<128x32xbf16, #tpu.memory_space<vmem>>, vector<32x32xbf16>
    %cst_14 = arith.constant dense<0.000000e+00> : vector<16x32xf32>
    %26 = tpu.matmul %24, %25, %cst_14 {dimension_numbers = #tpu.dot_dimension_numbers<[1], [0], [0], [1], [0, 0, 1, 1], [], []>} : vector<16x32xbf16>, vector<32x32xbf16>, vector<16x32xf32> -> vector<16x32xf32>
    %27 = vector.extract_strided_slice %2 {offsets = [3, 0], sizes = [1, 32], strides = [1, 1]} : vector<16x32xf32> to vector<1x32xf32>
    %28 = vector.broadcast %27 : vector<1x32xf32> to vector<16x32xf32>
    %29 = arith.addf %26, %28 : vector<16x32xf32>
    %cst_15 = arith.constant 0.000000e+00 : f32
    %30 = vector.broadcast %cst_15 : f32 to vector<16x32xf32>
    %31 = arith.cmpf ogt, %29, %30 : vector<16x32xf32>
    %cst_16 = arith.constant 2.000000e-01 : f32
    %32 = vector.broadcast %cst_16 : f32 to vector<16x32xf32>
    %33 = arith.mulf %32, %29 : vector<16x32xf32>
    %34 = arith.select %31, %29, %33 : vector<16x32xi1>, vector<16x32xf32>
    %35 = arith.truncf %34 : vector<16x32xf32> to vector<16x32xbf16>
    %cst_17 = arith.constant dense<0.000000e+00> : vector<16x32xf32>
    %36 = tpu.matmul %1, %35, %cst_17 {dimension_numbers = #tpu.dot_dimension_numbers<[1], [0], [0], [1], [0, 0, 1, 1], [], []>} : vector<16x16xbf16>, vector<16x32xbf16>, vector<16x32xf32> -> vector<16x32xf32>
    %37 = arith.addf %36, %34 : vector<16x32xf32>
    %38 = arith.truncf %37 : vector<16x32xf32> to vector<16x32xbf16>
    %c32 = arith.constant 32 : index
    %c0_18 = arith.constant 0 : index
    %39 = vector.load %arg5[%c32, %c0_18] : memref<128x32xbf16, #tpu.memory_space<vmem>>, vector<32x32xbf16>
    %cst_19 = arith.constant dense<0.000000e+00> : vector<16x32xf32>
    %40 = tpu.matmul %38, %39, %cst_19 {dimension_numbers = #tpu.dot_dimension_numbers<[1], [0], [0], [1], [0, 0, 1, 1], [], []>} : vector<16x32xbf16>, vector<32x32xbf16>, vector<16x32xf32> -> vector<16x32xf32>
    %41 = vector.extract_strided_slice %2 {offsets = [4, 0], sizes = [1, 32], strides = [1, 1]} : vector<16x32xf32> to vector<1x32xf32>
    %42 = vector.broadcast %41 : vector<1x32xf32> to vector<16x32xf32>
    %43 = arith.addf %40, %42 : vector<16x32xf32>
    %cst_20 = arith.constant 0.000000e+00 : f32
    %44 = vector.broadcast %cst_20 : f32 to vector<16x32xf32>
    %45 = arith.cmpf ogt, %43, %44 : vector<16x32xf32>
    %cst_21 = arith.constant 2.000000e-01 : f32
    %46 = vector.broadcast %cst_21 : f32 to vector<16x32xf32>
    %47 = arith.mulf %46, %43 : vector<16x32xf32>
    %48 = arith.select %45, %43, %47 : vector<16x32xi1>, vector<16x32xf32>
    %49 = vector.extract_strided_slice %2 {offsets = [5, 0], sizes = [1, 32], strides = [1, 1]} : vector<16x32xf32> to vector<1x32xf32>
    %50 = vector.broadcast %49 : vector<1x32xf32> to vector<16x32xf32>
    %51 = arith.mulf %48, %50 : vector<16x32xf32>
    %52 = vector.extract_strided_slice %2 {offsets = [6, 0], sizes = [1, 32], strides = [1, 1]} : vector<16x32xf32> to vector<1x32xf32>
    %53 = vector.broadcast %52 : vector<1x32xf32> to vector<16x32xf32>
    %54 = arith.addf %51, %53 : vector<16x32xf32>
    %55 = arith.truncf %54 : vector<16x32xf32> to vector<16x32xbf16>
    %c64 = arith.constant 64 : index
    %c0_22 = arith.constant 0 : index
    %56 = vector.load %arg5[%c64, %c0_22] : memref<128x32xbf16, #tpu.memory_space<vmem>>, vector<32x32xbf16>
    %cst_23 = arith.constant dense<0.000000e+00> : vector<16x32xf32>
    %57 = tpu.matmul %55, %56, %cst_23 {dimension_numbers = #tpu.dot_dimension_numbers<[1], [0], [0], [1], [0, 0, 1, 1], [], []>} : vector<16x32xbf16>, vector<32x32xbf16>, vector<16x32xf32> -> vector<16x32xf32>
    %58 = vector.extract_strided_slice %2 {offsets = [7, 0], sizes = [1, 32], strides = [1, 1]} : vector<16x32xf32> to vector<1x32xf32>
    %59 = vector.broadcast %58 : vector<1x32xf32> to vector<16x32xf32>
    %60 = arith.addf %57, %59 : vector<16x32xf32>
    %cst_24 = arith.constant 0.000000e+00 : f32
    %61 = vector.broadcast %cst_24 : f32 to vector<16x32xf32>
    %62 = arith.cmpf ogt, %60, %61 : vector<16x32xf32>
    %cst_25 = arith.constant 2.000000e-01 : f32
    %63 = vector.broadcast %cst_25 : f32 to vector<16x32xf32>
    %64 = arith.mulf %63, %60 : vector<16x32xf32>
    %65 = arith.select %62, %60, %64 : vector<16x32xi1>, vector<16x32xf32>
    %c0_26 = arith.constant 0 : index
    %c0_27 = arith.constant 0 : index
    %66 = vector.load %arg3[%c0_26, %c0_27] : memref<2x16xbf16, #tpu.memory_space<vmem>>, vector<2x16xbf16>
    %67 = arith.truncf %65 : vector<16x32xf32> to vector<16x32xbf16>
    %cst_28 = arith.constant dense<0.000000e+00> : vector<2x32xf32>
    %68 = tpu.matmul %66, %67, %cst_28 {dimension_numbers = #tpu.dot_dimension_numbers<[1], [0], [0], [1], [0, 0, 1, 1], [], []>} : vector<2x16xbf16>, vector<16x32xbf16>, vector<2x32xf32> -> vector<2x32xf32>
    %69 = vector.extract_strided_slice %2 {offsets = [8, 0], sizes = [1, 32], strides = [1, 1]} : vector<16x32xf32> to vector<1x32xf32>
    %70 = vector.broadcast %69 : vector<1x32xf32> to vector<2x32xf32>
    %71 = arith.mulf %68, %70 : vector<2x32xf32>
    %72 = vector.extract_strided_slice %2 {offsets = [9, 0], sizes = [1, 32], strides = [1, 1]} : vector<16x32xf32> to vector<1x32xf32>
    %73 = vector.broadcast %72 : vector<1x32xf32> to vector<2x32xf32>
    %74 = arith.addf %71, %73 : vector<2x32xf32>
    %75 = arith.truncf %74 : vector<2x32xf32> to vector<2x32xbf16>
    %c96 = arith.constant 96 : index
    %c0_29 = arith.constant 0 : index
    %76 = vector.load %arg5[%c96, %c0_29] : memref<128x32xbf16, #tpu.memory_space<vmem>>, vector<32x32xbf16>
    %cst_30 = arith.constant dense<0.000000e+00> : vector<2x32xf32>
    %77 = tpu.matmul %75, %76, %cst_30 {dimension_numbers = #tpu.dot_dimension_numbers<[1], [0], [0], [1], [0, 0, 1, 1], [], []>} : vector<2x32xbf16>, vector<32x32xbf16>, vector<2x32xf32> -> vector<2x32xf32>
    %78 = vector.extract_strided_slice %2 {offsets = [10, 0], sizes = [1, 32], strides = [1, 1]} : vector<16x32xf32> to vector<1x32xf32>
    %79 = vector.broadcast %78 : vector<1x32xf32> to vector<2x32xf32>
    %80 = arith.addf %77, %79 : vector<2x32xf32>
    %81 = arith.truncf %80 : vector<2x32xf32> to vector<2x32xbf16>
    %c0_31 = arith.constant 0 : index
    %c0_32 = arith.constant 0 : index
    %82 = vector.load %arg6[%c0_31, %c0_32] : memref<32x16xbf16, #tpu.memory_space<vmem>>, vector<32x16xbf16>
    %cst_33 = arith.constant dense<0.000000e+00> : vector<2x16xf32>
    %83 = tpu.matmul %81, %82, %cst_33 {dimension_numbers = #tpu.dot_dimension_numbers<[1], [0], [0], [1], [0, 0, 1, 1], [], []>} : vector<2x32xbf16>, vector<32x16xbf16>, vector<2x16xf32> -> vector<2x16xf32>
    %84 = vector.extract_strided_slice %3 {offsets = [0, 0], sizes = [1, 16], strides = [1, 1]} : vector<8x128xf32> to vector<1x16xf32>
    %85 = vector.broadcast %84 : vector<1x16xf32> to vector<2x16xf32>
    %86 = arith.addf %83, %85 : vector<2x16xf32>
    %87 = arith.truncf %86 : vector<2x16xf32> to vector<2x16xbf16>
    %c0_34 = arith.constant 0 : index
    %c0_35 = arith.constant 0 : index
    %88 = vector.load %arg8[%c0_34, %c0_35] : memref<16x32xbf16, #tpu.memory_space<vmem>>, vector<16x32xbf16>
    %cst_36 = arith.constant dense<0.000000e+00> : vector<2x32xf32>
    %89 = tpu.matmul %87, %88, %cst_36 {dimension_numbers = #tpu.dot_dimension_numbers<[1], [0], [0], [1], [0, 0, 1, 1], [], []>} : vector<2x16xbf16>, vector<16x32xbf16>, vector<2x32xf32> -> vector<2x32xf32>
    %90 = vector.extract_strided_slice %3 {offsets = [1, 0], sizes = [1, 32], strides = [1, 1]} : vector<8x128xf32> to vector<1x32xf32>
    %91 = vector.broadcast %90 : vector<1x32xf32> to vector<2x32xf32>
    %92 = arith.addf %89, %91 : vector<2x32xf32>
    %cst_37 = arith.constant 0.000000e+00 : f32
    %93 = vector.broadcast %cst_37 : f32 to vector<2x32xf32>
    %94 = arith.maximumf %92, %93 : vector<2x32xf32>
    %95 = arith.truncf %94 : vector<2x32xf32> to vector<2x32xbf16>
    %c0_38 = arith.constant 0 : index
    %c0_39 = arith.constant 0 : index
    %96 = vector.load %arg9[%c0_38, %c0_39] : memref<32x32xbf16, #tpu.memory_space<vmem>>, vector<32x32xbf16>
    %cst_40 = arith.constant dense<0.000000e+00> : vector<2x32xf32>
    %97 = tpu.matmul %95, %96, %cst_40 {dimension_numbers = #tpu.dot_dimension_numbers<[1], [0], [0], [1], [0, 0, 1, 1], [], []>} : vector<2x32xbf16>, vector<32x32xbf16>, vector<2x32xf32> -> vector<2x32xf32>
    %98 = vector.extract_strided_slice %3 {offsets = [2, 0], sizes = [1, 32], strides = [1, 1]} : vector<8x128xf32> to vector<1x32xf32>
    %99 = vector.broadcast %98 : vector<1x32xf32> to vector<2x32xf32>
    %100 = arith.addf %97, %99 : vector<2x32xf32>
    %cst_41 = arith.constant 0.000000e+00 : f32
    %101 = vector.broadcast %cst_41 : f32 to vector<2x32xf32>
    %102 = arith.maximumf %100, %101 : vector<2x32xf32>
    %103 = arith.truncf %102 : vector<2x32xf32> to vector<2x32xbf16>
    %c0_42 = arith.constant 0 : index
    %c0_43 = arith.constant 0 : index
    %104 = vector.load %arg10[%c0_42, %c0_43] : memref<32x128xbf16, #tpu.memory_space<vmem>>, vector<32x128xbf16>
    %cst_44 = arith.constant dense<0.000000e+00> : vector<2x128xf32>
    %105 = tpu.matmul %103, %104, %cst_44 {dimension_numbers = #tpu.dot_dimension_numbers<[1], [0], [0], [1], [0, 0, 1, 1], [], []>} : vector<2x32xbf16>, vector<32x128xbf16>, vector<2x128xf32> -> vector<2x128xf32>
    %106 = vector.extract_strided_slice %3 {offsets = [3, 0], sizes = [1, 128], strides = [1, 1]} : vector<8x128xf32> to vector<1x128xf32>
    %107 = vector.broadcast %106 : vector<1x128xf32> to vector<2x128xf32>
    %108 = arith.addf %105, %107 : vector<2x128xf32>
    %c0_45 = arith.constant 0 : index
    %c0_46 = arith.constant 0 : index
    %109 = vector.load %arg12[%c0_45, %c0_46] : memref<2x128xf32, #tpu.memory_space<vmem>>, vector<2x128xf32>
    %110 = arith.addf %108, %109 : vector<2x128xf32>
    %cst_47 = arith.constant 0.000000e+00 : f32
    %111 = vector.broadcast %cst_47 : f32 to vector<2x128xf32>
    %112 = arith.cmpf oge, %110, %111 : vector<2x128xf32>
    %cst_48 = arith.constant 1.000000e+00 : f32
    %cst_49 = arith.constant 0.000000e+00 : f32
    %113 = vector.broadcast %cst_48 : f32 to vector<2x128xf32>
    %114 = vector.broadcast %cst_49 : f32 to vector<2x128xf32>
    %115 = arith.select %112, %113, %114 : vector<2x128xi1>, vector<2x128xf32>
    %116 = arith.truncf %115 : vector<2x128xf32> to vector<2x128xbf16>
    %c0_50 = arith.constant 0 : index
    %c0_51 = arith.constant 0 : index
    %117 = vector.load %arg13[%c0_50, %c0_51] : memref<128x128xbf16, #tpu.memory_space<vmem>>, vector<128x128xbf16>
    %cst_52 = arith.constant dense<0.000000e+00> : vector<2x128xf32>
    %118 = tpu.matmul %116, %117, %cst_52 {dimension_numbers = #tpu.dot_dimension_numbers<[1], [0], [0], [1], [0, 0, 1, 1], [], []>} : vector<2x128xbf16>, vector<128x128xbf16>, vector<2x128xf32> -> vector<2x128xf32>
    %c0_53 = arith.constant 0 : index
    %c0_54 = arith.constant 0 : index
    %119 = vector.load %arg14[%c0_53, %c0_54] : memref<2x128xf32, #tpu.memory_space<vmem>>, vector<2x128xf32>
    tpu.vector_store %arg14[%c0_53, %c0_54], %118 {strides = array<i32>} : memref<2x128xf32, #tpu.memory_space<vmem>>, vector<2x128xf32>,
    return
  }
  func.func @transform_0(%arg0: i32) -> (i32, i32) {
    %c0_i32 = arith.constant 0 : i32
    %c0_i32_0 = arith.constant 0 : i32
    %c0_i32_1 = arith.constant 0 : i32
    return %c0_i32, %c0_i32_0 : i32, i32
  }
  func.func @transform_1(%arg0: i32) -> (i32, i32) {
    %c0_i32 = arith.constant 0 : i32
    %c0_i32_0 = arith.constant 0 : i32
    %c0_i32_1 = arith.constant 0 : i32
    return %c0_i32, %c0_i32_0 : i32, i32
  }
  func.func @transform_2(%arg0: i32) -> (i32, i32) {
    %c0_i32 = arith.constant 0 : i32
    %c0_i32_0 = arith.constant 0 : i32
    %c0_i32_1 = arith.constant 0 : i32
    return %c0_i32, %c0_i32_0 : i32, i32
  }
  func.func @transform_3(%arg0: i32) -> (i32, i32) {
    %c0_i32 = arith.constant 0 : i32
    %c0_i32_0 = arith.constant 0 : i32
    %c0_i32_1 = arith.constant 0 : i32
    return %c0_i32, %c0_i32_0 : i32, i32
  }
  func.func @transform_4(%arg0: i32) -> (i32, i32) {
    %c0_i32 = arith.constant 0 : i32
    %c0_i32_0 = arith.constant 0 : i32
    %c0_i32_1 = arith.constant 0 : i32
    return %c0_i32, %c0_i32_0 : i32, i32
  }
  func.func @transform_5(%arg0: i32) -> (i32, i32) {
    %c0_i32 = arith.constant 0 : i32
    %c0_i32_0 = arith.constant 0 : i32
    %c0_i32_1 = arith.constant 0 : i32
    return %c0_i32, %c0_i32_0 : i32, i32
  }
  func.func @transform_6(%arg0: i32) -> (i32, i32) {
    %c0_i32 = arith.constant 0 : i32
    %c0_i32_0 = arith.constant 0 : i32
    %c0_i32_1 = arith.constant 0 : i32
    return %c0_i32, %c0_i32_0 : i32, i32
  }
  func.func @transform_7(%arg0: i32) -> (i32, i32) {
    %c0_i32 = arith.constant 0 : i32
    %c0_i32_0 = arith.constant 0 : i32
    %c0_i32_1 = arith.constant 0 : i32
    return %c0_i32, %c0_i32_0 : i32, i32
  }
  func.func @transform_8(%arg0: i32) -> (i32, i32) {
    %c0_i32 = arith.constant 0 : i32
    %c0_i32_0 = arith.constant 0 : i32
    %c0_i32_1 = arith.constant 0 : i32
    return %c0_i32, %c0_i32_0 : i32, i32
  }
  func.func @transform_9(%arg0: i32) -> (i32, i32) {
    %c0_i32 = arith.constant 0 : i32
    %c0_i32_0 = arith.constant 0 : i32
    %c0_i32_1 = arith.constant 0 : i32
    return %c0_i32, %c0_i32_0 : i32, i32
  }
  func.func @transform_10(%arg0: i32) -> (i32, i32) {
    %c0_i32 = arith.constant 0 : i32
    %c0_i32_0 = arith.constant 0 : i32
    %c0_i32_1 = arith.constant 0 : i32
    return %c0_i32, %c0_i32_0 : i32, i32
  }
  func.func @transform_11(%arg0: i32) -> (i32, i32) {
    %c0_i32 = arith.constant 0 : i32
    %c0_i32_0 = arith.constant 0 : i32
    %c0_i32_1 = arith.constant 0 : i32
    return %c0_i32, %c0_i32_0 : i32, i32
  }
  func.func @transform_12(%arg0: i32) -> (i32, i32) {
    %c0_i32 = arith.constant 0 : i32
    %c0_i32_0 = arith.constant 0 : i32
    %c0_i32_1 = arith.constant 0 : i32
    return %c0_i32, %c0_i32_0 : i32, i32
  }
  func.func @transform_13(%arg0: i32) -> (i32, i32) {
    %c0_i32 = arith.constant 0 : i32
    %c0_i32_0 = arith.constant 0 : i32
    %c0_i32_1 = arith.constant 0 : i32
    return %c0_i32, %c0_i32_0 : i32, i32
  }
}

</mosaic_0001>

<bundles_post_ra>
// kernel: tpu_custom_call.1
= control target key start
LH: loop header
LB: loop body
LE: loop exit
PB: predicated region body
PF: predicated region fallthrough
CT: control target
= control target key end

     0   :  { %18 = vsyncpa [#allocation3], 0  ;;  %s1572_s0 = inlined_call_operand.vmem [shape: bf16[16,4], index: 0, kind: input, shape index: {}]   ;;  %s1573_s1 = inlined_call_operand.vmem [shape: bf16[16,16], index: 1, kind: input, shape index: {}]   ;;  %s1574_s2 = inlined_call_operand.hbm [shape: bf16[2,16], index: 2, kind: input, shape index: {}]   ;;  %s1575_s3 = inlined_call_operand.hbm [shape: bf16[4,32], index: 3, kind: input, shape index: {}]   ;;  %s1576_s4 = inlined_call_operand.vmem [shape: bf16[128,32], index: 4, kind: input, shape index: {}]   ;;  %s1577_s5 = inlined_call_operand.vmem [shape: bf16[32,16], index: 5, kind: input, shape index: {}]   ;;  %s1578_s6 = inlined_call_operand.vmem [shape: f32[16,32], index: 6, kind: input, shape index: {}]   ;;  %s1579_s7 = inlined_call_operand.vmem [shape: bf16[16,32], index: 7, kind: input, shape index: {}]   ;;  %s1580_s8 = inlined_call_operand.vmem [shape: bf16[32,32], index: 8, kind: input, shape index: {}]   ;;  %s1581_s9 = inlined_call_operand.vmem [shape: bf16[32,128], index: 9, kind: input, shape index: {}]   ;;  %s1582_s10 = inlined_call_operand.vmem [shape: f32[8,128], index: 10, kind: input, shape index: {}]   ;;  %s1583_s11 = inlined_call_operand.vmem [shape: f32[2,128], index: 11, kind: input, shape index: {}]   ;;  %s1584_s12 = inlined_call_operand.vmem [shape: bf16[128,128], index: 12, kind: input, shape index: {}]   ;;  %s1585_s13 = inlined_call_operand.hbm [shape: f32[2,128], index: 13, kind: output, shape index: {}]  }
   0x1   :  { %19 = vsyncpa [#allocation6], 0 }
   0x2   :  { %20 = vsyncpa [#allocation4], 0  ;;  %s1260_s25 = smov [#allocation2]   ;;  %s1261_s27 = smov [#allocation5]  }
   0x3   :  { %s31_s26 = sshll.u32 %s1260_s25, 4  ;;  %s41_s28 = sshll.u32 %s1261_s27, 4  ;;  %s32_s26 = int_to_ptr.vmem [resolvable:$true] %s31_s26  ;;  %s42_s28 = int_to_ptr.vmem [resolvable:$true] %s41_s28 }
   0x4   :  { %s1188_s14 = scalar_lea.hbm %s1574_s2, 16 }
   0x5   :  { %p1189_p0 = scmp.ne.s32.totalorder %s1574_s2, %s1188_s14  ;;  %p1192_p1 = scmp.lt.u32.totalorder %s1188_s14, %s1574_s2 }
   0x7   :  { %p1194_p2 = pnand %p1192_p1, %p1189_p0 }
   0x9   :  { %1197 = shalt.err (!%p1194_p2)
}
   0xa   :  { %s1198_s19 = scalar_lea.vmem %s32_s26, 16  ;;  %s1202_s20 = scalar_lea.vmem %s32_s26, 32 }
   0xb   :  { %p1199_p3 = scmp.ne.s32.totalorder %s32_s26, %s1198_s19  ;;  %p1203_p4 = scmp.lt.s32.totalorder %s32_s26, %s32_s26 }
   0xc   :  { %p1204_p5 = scmp.lt.s32.totalorder %s1202_s20, %s1198_s19 }
   0xe   :  { %p1205_p6 = por %p1204_p5, %p1203_p4 }
  0x10   :  { %p1206_p7 = pnand %p1205_p6, %p1199_p3 }
  0x12   :  { %1209 = shalt.err (!%p1206_p7)
}
  0x13   :  { %34 = dma.hbm_to_vmem [thread:$0]  %s1574_s2, 16, %s32_s26, [#allocation3]  }
  0x14   :  { %s1210_s25 = scalar_lea.hbm %s1575_s3, 32 }
  0x15   :  { %p1211_p8 = scmp.ne.s32.totalorder %s1575_s3, %s1210_s25  ;;  %p1214_p9 = scmp.lt.u32.totalorder %s1210_s25, %s1575_s3 }
  0x17   :  { %p1216_p10 = pnand %p1214_p9, %p1211_p8 }
  0x19   :  { %1219 = shalt.err (!%p1216_p10)
}
  0x1a   :  { %s1220_s15 = scalar_lea.vmem %s42_s28, 32  ;;  %p1225_p12 = scmp.lt.s32.totalorder %s42_s28, %s42_s28 }
  0x1b   :  { %p1221_p11 = scmp.ne.s32.totalorder %s42_s28, %s1220_s15  ;;  %p1226_p13 = scmp.lt.s32.totalorder %s1220_s15, %s1220_s15 }
  0x1d   :  { %p1227_p0 = por %p1226_p13, %p1225_p12 }
  0x1f   :  { %p1228_p1 = pnand %p1227_p0, %p1221_p11 }
  0x21   :  { %1231 = shalt.err (!%p1228_p1)
}
  0x22   :  { %44 = dma.hbm_to_vmem [thread:$0]  %s1575_s3, 32, %s42_s28, [#allocation6]  }
  0x23   :  { %1254 = dma.done.wait [#allocation3], 16  }
  0x24   :  { %1255 = vsyncadd [#allocation3], 4294967280 }
  0x25   :  { %1256 = dma.done.wait [#allocation6], 32  }
  0x26   :  { %1257 = vsyncadd [#allocation6], 4294967264  ;;  %v1262_v0 = vmov 0.0   ;;  %vm1263_vm0 = vmmov 0   ;;  %v70_v1 = vld [vmem:[%s1572_s0] sm:$0xff]   ;;  %vm90_vm1 = vcmask 130048   ;;  %v137_v16 = vlaneseq }
  0x27   :  { %1050 = vmatprep.subr.bf16.mxu0 %v1262_v0  ;;  %1052 = vmatprep.mubr.msk.bf16.mxu0 %vm1263_vm0, %v1262_v0  ;;  %v1372_v2 = vld [vmem:[%s1573_s1] sm:$0xff]   ;;  %v136_v3 = vld [vmem:[#allocation5] sm:$0x3]  ;;  %vm145_vm2 = vcmask 1041408   ;;  %v77_v5 = vunpack.c.l.bf16 %v70_v1  ;;  %v78_v6 = vunpack.c.h.bf16 %v70_v1  ;;  %vm141_vm3 = vcmask 31744   ;;  %v1165_v15 = vld [vmem:[%s1576_s4 + $0x8] sm:$0xff]  }
  0x28   :  { %1056 = vmatprep.subr.bf16.mxu1 %v1262_v0  ;;  %1058 = vmatprep.mubr.msk.bf16.mxu1 %vm1263_vm0, %v1262_v0  ;;  %v147_v4 = vsel %vm145_vm2, %v136_v3, 0  ;;  %v1164_v14 = vld [vmem:[%s1576_s4] sm:$0xff]   ;;  %v1390_v17 = vshrl.u32 %v137_v16, 7  ;;  %vm229_vm6 = vcmask 261120   ;;  %v1166_v53 = vld [vmem:[%s1576_s4 + $0x10] sm:$0xff]   ;;  %v1167_v54 = vld [vmem:[%s1576_s4 + $0x18] sm:$0xff]  }
  0x29   :  { %1051 = vmatpush3.bf16.msra.mxu0 %v70_v1  ;;  %1057 = vmatpush3.bf16.msra.mxu1 %v147_v4  ;;  %v1398_v19 = vld [vmem:[%s1578_s6] sm:$0xff]  ;;  %v1169_v63 = vld [vmem:[%s1576_s4 + $0x28] sm:$0xff]  }
  0x2a   :  { %1092 = vmatprep.subr.bf16.mxu0 %v1262_v0  ;;  %1062 = vmatprep.subr.bf16.mxu1 %v1262_v0  ;;  %v1393_v18 = vsub.s32 0, %v1390_v17  ;;  %v1403_v21 = vsub.s32 1, %v1390_v17  ;;  %v1408_v26 = vsub.s32 2, %v1390_v17  ;;  %v215_v40 = vsub.s32 3, %v1390_v17  ;;  %v1168_v62 = vld [vmem:[%s1576_s4 + $0x20] sm:$0xff]  }
  0x2b   :  { %v329_v1 = vsub.s32 4, %v1390_v17  ;;  %v395_v3 = vsub.s32 5, %v1390_v17 }
  0x2c   :  { %1053 = vmatmul.mubr.msk.bf16.vlgmr.msra.gmra.mrb[0].mxu0 %vm90_vm1, %v1372_v2  ;;  %v140_v20 = vrot.slane %v1398_v19, %v1393_v18  ;;  %v199_v25 = vrot.slane %v1398_v19, %v1403_v21  ;;  %v205_v34 = vrot.slane %v1398_v19, %v1408_v26  ;;  %v216_v41 = vrot.slane %v1398_v19, %v215_v40 }
  0x2d   :  { %1094 = vmatprep.mubr.msk.bf16.mxu0 %vm1263_vm0, %v1262_v0 }
  0xff   :  { %v128_v7 = vpop.f32.mrb[0].mxu0 }
 0x100   :  { %v1054_v8 = vpop.f32.mrb[1].mxu0  ;;  %v129_v10 = vadd.f32 %v128_v7, %v77_v5  ;;  %v396_v7 = vrot.slane %v1398_v19, %v395_v3 }
 0x101   :  { %v131_v9 = vpop.f32.mrb[2].mxu0  ;;  %v401_v8 = vsub.s32 6, %v1390_v17 }
 0x102   :  { %v132_v11 = vadd.f32 %v131_v9, %v78_v6  ;;  %v1055_v12 = vpop.f32.mrb[3].mxu0 }
 0x103   :  { %v402_v16 = vrot.slane %v1398_v19, %v401_v8  ;;  %v1175_v8 = vld [vmem:[%s1580_s8] sm:$0xff]  }
 0x104   :  { %v135_v13 = vpack.c.bf16 %v132_v11, %v129_v10 }
 0x106   :  { %1059 = vmatmul.mubr.msk.bf16.vlgmr.msra.gmra.mrb[0].mxu1 %vm141_vm3, %v135_v13 }
 0x107   :  { %1066 = vmatprep.mubr.msk.bf16.mxu1 %vm1263_vm0, %v1262_v0  ;;  %1063 = vmatpush3.bf16.msra.mxu1 %v1164_v14 }
 0x108   :  { %1064 = vmatprep.subr.bf16.mxu1 %v1262_v0 }
 0x10b   :  { %1065 = vmatpush3.bf16.msra.mxu1 %v1165_v15 }
 0x10c   :  { %1070 = vmatprep.subr.bf16.mxu1 %v1262_v0 }
 0x1d9   :  { %v183_v22 = vpop.f32.mrb[0].mxu1 }
 0x1da   :  { %v184_v23 = vadd.f32 %v183_v22, %v140_v20  ;;  %v1060_v24 = vpop.f32.mrb[1].mxu1 }
 0x1db   :  { %v186_v27 = vpop.f32.mrb[2].mxu1 }
 0x1dc   :  { %vm190_vm4 = vcmp.gt.f32.partialorder %v184_v23, 0.0  ;;  %v192_v28 = vmul.f32 0.2, %v184_v23  ;;  %v187_v29 = vadd.f32 %v186_v27, %v140_v20  ;;  %v1061_v30 = vpop.f32.mrb[3].mxu1  ;;  %v412_v27 = vsub.s32 7, %v1390_v17 }
 0x1de   :  { %v194_v31 = vsel %vm190_vm4, %v184_v23, %v192_v28  ;;  %vm191_vm5 = vcmp.gt.f32.partialorder %v187_v29, 0.0  ;;  %v193_v32 = vmul.f32 0.2, %v187_v29  ;;  %v413_v28 = vrot.slane %v1398_v19, %v412_v27  ;;  %v1183_v27 = vld [vmem:[%s1584_s12 + $0x20] sm:$0xff]  }
 0x1df   :  { %v200_v33 = vmul.f32 %v199_v25, %v194_v31 }
 0x1e0   :  { %v195_v35 = vsel %vm191_vm5, %v187_v29, %v193_v32 }
 0x1e1   :  { %v201_v36 = vmul.f32 %v199_v25, %v195_v35  ;;  %v206_v37 = vadd.f32 %v205_v34, %v200_v33 }
 0x1e3   :  { %v207_v38 = vadd.f32 %v205_v34, %v201_v36 }
 0x1e5   :  { %v208_v39 = vpack.c.bf16 %v207_v38, %v206_v37 }
 0x1e7   :  { %1067 = vmatmul.mubr.msk.bf16.vlgmr.msra.gmra.mrb[4].mxu1 %vm229_vm6, %v208_v39 }
 0x1e8   :  { %1072 = vmatprep.mubr.msk.bf16.mxu1 %vm1263_vm0, %v1262_v0 }
 0x2ba   :  { %v267_v42 = vpop.f32.mrb[4].mxu1 }
 0x2bb   :  { %v268_v43 = vadd.f32 %v267_v42, %v216_v41  ;;  %v1068_v44 = vpop.f32.mrb[5].mxu1  ;;  %v1171_v42 = vld [vmem:[%s1576_s4 + $0x38] sm:$0xff]  }
 0x2bc   :  { %v270_v45 = vpop.f32.mrb[6].mxu1  ;;  %v75_v44 = vld [vmem:[%s1578_s6 + $0x8] sm:$0xff] }
 0x2bd   :  { %v276_v46 = vmul.f32 0.2, %v268_v43  ;;  %v271_v47 = vadd.f32 %v270_v45, %v216_v41  ;;  %v1069_v48 = vpop.f32.mrb[7].mxu1  ;;  %vm274_vm7 = vcmp.gt.f32.partialorder %v268_v43, 0.0  ;;  %v476_v41 = vld [vmem:[#allocation2] sm:$0x1]  ;;  %v524_v45 = vrot.slane %v75_v44, %v1393_v18 }
 0x2bf   :  { %vm275_vm8 = vcmp.gt.f32.partialorder %v271_v47, 0.0  ;;  %v277_v49 = vmul.f32 0.2, %v271_v47  ;;  %v278_v50 = vsel %vm274_vm7, %v268_v43, %v276_v46  ;;  %v1172_v43 = vld [vmem:[%s1577_s5] sm:$0xff]   ;;  %v529_v46 = vrot.slane %v75_v44, %v1403_v21 }
 0x2c1   :  { %v279_v51 = vsel %vm275_vm8, %v271_v47, %v277_v49 }
 0x2c2   :  { %v280_v52 = vpack.c.bf16 %v279_v51, %v278_v50 }
 0x2c4   :  { %1071 = vmatpush3.bf16.msra.mxu1 %v280_v52 }
 0x2c5   :  { %1076 = vmatprep.subr.bf16.mxu1 %v1262_v0 }
 0x2c7   :  { %1073 = vmatmul.mubr.msk.bf16.vlgmr.msra.gmra.mrb[8].mxu1 %vm90_vm1, %v1372_v2  ;;  %v330_v2 = vrot.slane %v1398_v19, %v329_v1  ;;  %v1170_v19 = vld [vmem:[%s1576_s4 + $0x30] sm:$0xff]  }
 0x2c8   :  { %1080 = vmatprep.mubr.msk.bf16.mxu1 %vm1263_vm0, %v1262_v0  ;;  %1077 = vmatpush3.bf16.msra.mxu1 %v1166_v53 }
 0x2c9   :  { %1078 = vmatprep.subr.bf16.mxu1 %v1262_v0 }
 0x2cc   :  { %1079 = vmatpush3.bf16.msra.mxu1 %v1167_v54  ;;  %v1173_v54 = vld [vmem:[%s1577_s5 + $0x8] sm:$0xff]  }
 0x2cd   :  { %1084 = vmatprep.subr.bf16.mxu1 %v1262_v0 }
 0x39a   :  { %v315_v55 = vpop.f32.mrb[8].mxu1 }
 0x39b   :  { %v1074_v56 = vpop.f32.mrb[9].mxu1  ;;  %v316_v58 = vadd.f32 %v315_v55, %v278_v50  ;;  %v539_v55 = vrot.slane %v75_v44, %v1408_v26 }
 0x39c   :  { %v318_v57 = vpop.f32.mrb[10].mxu1 }
 0x39d   :  { %v319_v59 = vadd.f32 %v318_v57, %v279_v51  ;;  %v1075_v60 = vpop.f32.mrb[11].mxu1 }
 0x39f   :  { %v322_v61 = vpack.c.bf16 %v319_v59, %v316_v58 }
 0x3a1   :  { %1081 = vmatmul.mubr.msk.bf16.vlgmr.msra.gmra.mrb[12].mxu1 %vm229_vm6, %v322_v61 }
 0x3a2   :  { %1088 = vmatprep.mubr.msk.bf16.mxu1 %vm1263_vm0, %v1262_v0  ;;  %1085 = vmatpush3.bf16.msra.mxu1 %v1168_v62  ;;  %v1174_v62 = vld [vmem:[%s1579_s7] sm:$0xff]  }
 0x3a3   :  { %1086 = vmatprep.subr.bf16.mxu1 %v1262_v0 }
 0x3a6   :  { %1087 = vmatpush3.bf16.msra.mxu1 %v1169_v63  ;;  %v1493_v63 = vld [vmem:[%s1582_s10] sm:$0xff] }
 0x3a7   :  { %1098 = vmatprep.subr.bf16.mxu1 %v1262_v0  ;;  %v603_v1 = vrot.slane %v1493_v63, %v1393_v18  ;;  %v1176_v18 = vld [vmem:[%s1580_s8 + $0x8] sm:$0xff]  }
 0x474   :  { %v380_v4 = vpop.f32.mrb[12].mxu1 }
 0x475   :  { %v381_v5 = vadd.f32 %v380_v4, %v330_v2  ;;  %v1082_v6 = vpop.f32.mrb[13].mxu1 }
 0x476   :  { %v383_v9 = vpop.f32.mrb[14].mxu1 }
 0x477   :  { %vm387_vm9 = vcmp.gt.f32.partialorder %v381_v5, 0.0  ;;  %v389_v10 = vmul.f32 0.2, %v381_v5  ;;  %v384_v11 = vadd.f32 %v383_v9, %v330_v2  ;;  %v1083_v12 = vpop.f32.mrb[15].mxu1  ;;  %v665_v9 = vrot.slane %v1493_v63, %v1403_v21  ;;  %v1178_v21 = vld [vmem:[%s1581_s9 + $0x8] sm:$0xff]  }
 0x479   :  { %v391_v13 = vsel %vm387_vm9, %v381_v5, %v389_v10  ;;  %vm388_vm10 = vcmp.gt.f32.partialorder %v384_v11, 0.0  ;;  %v390_v14 = vmul.f32 0.2, %v384_v11 }
 0x47a   :  { %v397_v15 = vmul.f32 %v396_v7, %v391_v13 }
 0x47b   :  { %v392_v20 = vsel %vm388_vm10, %v384_v11, %v390_v14 }
 0x47c   :  { %v398_v22 = vmul.f32 %v396_v7, %v392_v20  ;;  %v403_v23 = vadd.f32 %v402_v16, %v397_v15  ;;  %v1177_v20 = vld [vmem:[%s1581_s9] sm:$0xff]  }
 0x47e   :  { %v404_v24 = vadd.f32 %v402_v16, %v398_v22  ;;  %v1179_v22 = vld [vmem:[%s1584_s12] sm:$0xff]  }
 0x480   :  { %v405_v25 = vpack.c.bf16 %v404_v24, %v403_v23  ;;  %v1180_v23 = vld [vmem:[%s1584_s12 + $0x8] sm:$0xff]   ;;  %v1181_v24 = vld [vmem:[%s1584_s12 + $0x10] sm:$0xff]  }
 0x482   :  { %1089 = vmatmul.mubr.msk.bf16.vlgmr.msra.gmra.mrb[16].mxu1 %vm229_vm6, %v405_v25  ;;  %v1182_v25 = vld [vmem:[%s1584_s12 + $0x18] sm:$0xff]  }
 0x483   :  { %1102 = vmatprep.mubr.msk.bf16.mxu1 %vm1263_vm0, %v1262_v0  ;;  %1099 = vmatpush3.bf16.msra.mxu1 %v1170_v19 }
 0x484   :  { %1100 = vmatprep.subr.bf16.mxu1 %v1262_v0 }
 0x487   :  { %1101 = vmatpush3.bf16.msra.mxu1 %v1171_v42 }
 0x488   :  { %1114 = vmatprep.subr.bf16.mxu1 %v1262_v0 }
 0x555   :  { %v463_v29 = vpop.f32.mrb[16].mxu1 }
 0x556   :  { %v464_v30 = vadd.f32 %v463_v29, %v413_v28  ;;  %v1090_v31 = vpop.f32.mrb[17].mxu1  ;;  %v724_v29 = vrot.slane %v1493_v63, %v1408_v26  ;;  %v1186_v26 = vld [vmem:[%s1584_s12 + $0x38] sm:$0xff]  }
 0x557   :  { %v466_v32 = vpop.f32.mrb[18].mxu1 }
 0x558   :  { %v472_v33 = vmul.f32 0.2, %v464_v30  ;;  %v467_v34 = vadd.f32 %v466_v32, %v413_v28  ;;  %v1091_v35 = vpop.f32.mrb[19].mxu1  ;;  %vm470_vm11 = vcmp.gt.f32.partialorder %v464_v30, 0.0  ;;  %v1184_v28 = vld [vmem:[%s1584_s12 + $0x28] sm:$0xff]  }
 0x55a   :  { %vm471_vm12 = vcmp.gt.f32.partialorder %v467_v34, 0.0  ;;  %v473_v36 = vmul.f32 0.2, %v467_v34  ;;  %v474_v37 = vsel %vm470_vm11, %v464_v30, %v472_v33 }
 0x55c   :  { %v475_v38 = vsel %vm471_vm12, %v467_v34, %v473_v36 }
 0x55d   :  { %v477_v39 = vpack.c.bf16 %v475_v38, %v474_v37  ;;  %v1185_v37 = vld [vmem:[%s1584_s12 + $0x30] sm:$0xff]   ;;  %v789_v38 = vrot.slane %v1493_v63, %v215_v40  ;;  %s1265_s12 = smov [#allocation7]  }
 0x55e   :  { %s961_s5 = sshll.u32 %s1265_s12, 4  ;;  %s962_s5 = int_to_ptr.vmem [resolvable:$true] %s961_s5 }
 0x55f   :  { %1093 = vmatpush3.bf16.msra.mxu0 %v477_v39  ;;  %s1232_s19 = scalar_lea.vmem %s962_s5, 32  ;;  %p1237_p3 = scmp.lt.s32.totalorder %s962_s5, %s962_s5 }
 0x560   :  { %1106 = vmatprep.subr.bf16.mxu0 %v1262_v0  ;;  %p1233_p2 = scmp.ne.s32.totalorder %s962_s5, %s1232_s19  ;;  %p1238_p4 = scmp.lt.s32.totalorder %s1232_s19, %s1232_s19 }
 0x562   :  { %1095 = vmatmul.mubr.msk.bf16.vlgmr.msra.gmra.mrb[4].mxu0 %vm90_vm1, %v476_v41  ;;  %v845_v41 = vld [vmem:[%s1583_s11] sm:$0x3]  ;;  %p1239_p5 = por %p1238_p4, %p1237_p3 }
 0x563   :  { %1110 = vmatprep.mubr.msk.bf16.mxu0 %vm1263_vm0, %v1262_v0  ;;  %1107 = vmatpush3.bf16.msra.mxu0 %v1172_v43 }
 0x564   :  { %1108 = vmatprep.subr.bf16.mxu0 %v1262_v0  ;;  %p1240_p6 = pnand %p1239_p5, %p1233_p2 }
 0x567   :  { %1109 = vmatpush3.bf16.msra.mxu0 %v1173_v54 }
 0x568   :  { %1120 = vmatprep.subr.bf16.mxu0 %v1262_v0 }
 0x635   :  { %v515_v47 = vpop.f32.mrb[4].mxu0 }
 0x636   :  { %v525_v48 = vmul.f32 %v524_v45, %v515_v47  ;;  %v1096_v49 = vpop.f32.mrb[5].mxu0 }
 0x637   :  { %v518_v50 = vpop.f32.mrb[6].mxu0 }
 0x638   :  { %v530_v51 = vadd.f32 %v529_v46, %v525_v48  ;;  %v1097_v52 = vpop.f32.mrb[7].mxu0 }
 0x63a   :  { %v531_v53 = vpack.c.bf16 %v530_v51, %v530_v51 }
 0x63c   :  { %1103 = vmatmul.mubr.msk.bf16.vlgmr.msra.gmra.mrb[20].mxu1 %vm229_vm6, %v531_v53 }
 0x63d   :  { %1116 = vmatprep.mubr.msk.bf16.mxu1 %vm1263_vm0, %v1262_v0  ;;  %1115 = vmatpush3.bf16.msra.mxu1 %v1174_v62 }
 0x63e   :  { %1128 = vmatprep.subr.bf16.mxu1 %v1262_v0 }
 0x70f   :  { %v589_v56 = vpop.f32.mrb[20].mxu1 }
 0x710   :  { %v590_v57 = vadd.f32 %v589_v56, %v539_v55  ;;  %v1104_v58 = vpop.f32.mrb[21].mxu1 }
 0x711   :  { %v592_v59 = vpop.f32.mrb[22].mxu1 }
 0x712   :  { %v595_v60 = vpack.c.bf16 %v590_v57, %v590_v57  ;;  %v1105_v61 = vpop.f32.mrb[23].mxu1 }
 0x714   :  { %1111 = vmatmul.mubr.msk.bf16.vlgmr.msra.gmra.mrb[8].mxu0 %vm229_vm6, %v595_v60 }
 0x715   :  { %1124 = vmatprep.mubr.msk.bf16.mxu0 %vm1263_vm0, %v1262_v0  ;;  %1121 = vmatpush3.bf16.msra.mxu0 %v1175_v8 }
 0x716   :  { %1122 = vmatprep.subr.bf16.mxu0 %v1262_v0 }
 0x719   :  { %1123 = vmatpush3.bf16.msra.mxu0 %v1176_v18 }
 0x71a   :  { %1136 = vmatprep.subr.bf16.mxu0 %v1262_v0 }
 0x7e7   :  { %v653_v2 = vpop.f32.mrb[8].mxu0 }
 0x7e8   :  { %v654_v3 = vadd.f32 %v653_v2, %v603_v1  ;;  %v1112_v4 = vpop.f32.mrb[9].mxu0 }
 0x7e9   :  { %v656_v5 = vpop.f32.mrb[10].mxu0 }
 0x7ea   :  { %v659_v6 = vpack.c.bf16 %v654_v3, %v654_v3  ;;  %v1113_v7 = vpop.f32.mrb[11].mxu0 }
 0x7ec   :  { %1117 = vmatmul.mubr.msk.bf16.vlgmr.msra.gmra.mrb[24].mxu1 %vm90_vm1, %v659_v6 }
 0x7ed   :  { %1132 = vmatprep.mubr.msk.bf16.mxu1 %vm1263_vm0, %v1262_v0  ;;  %1129 = vmatpush3.bf16.msra.mxu1 %v1177_v20 }
 0x7ee   :  { %1130 = vmatprep.subr.bf16.mxu1 %v1262_v0 }
 0x7f1   :  { %1131 = vmatpush3.bf16.msra.mxu1 %v1178_v21 }
 0x8bf   :  { %v709_v10 = vpop.f32.mrb[24].mxu1 }
 0x8c0   :  { %v710_v11 = vadd.f32 %v709_v10, %v665_v9  ;;  %v1118_v12 = vpop.f32.mrb[25].mxu1 }
 0x8c1   :  { %v712_v13 = vpop.f32.mrb[26].mxu1 }
 0x8c2   :  { %v715_v14 = vmax.f32 %v710_v11, 0.0  ;;  %v1119_v15 = vpop.f32.mrb[27].mxu1 }
 0x8c4   :  { %v716_v16 = vpack.c.bf16 %v715_v14, %v715_v14 }
 0x8c6   :  { %1125 = vmatmul.mubr.msk.bf16.vlgmr.msra.gmra.mrb[12].mxu0 %vm229_vm6, %v716_v16 }
 0x8c7   :  { %1152 = vmatprep.mubr.msk.bf16.mxu0 %vm1263_vm0, %v1262_v0  ;;  %1137 = vmatpush3.bf16.msra.mxu0 %v1179_v22 }
 0x8c8   :  { %1138 = vmatprep.subr.bf16.mxu0 %v1262_v0 }
 0x8cb   :  { %1139 = vmatpush3.bf16.msra.mxu0 %v1180_v23 }
 0x8cc   :  { %1140 = vmatprep.subr.bf16.mxu0 %v1262_v0 }
 0x8cf   :  { %1141 = vmatpush3.bf16.msra.mxu0 %v1181_v24 }
 0x8d0   :  { %1142 = vmatprep.subr.bf16.mxu0 %v1262_v0 }
 0x8d3   :  { %1143 = vmatpush3.bf16.msra.mxu0 %v1182_v25 }
 0x8d4   :  { %1144 = vmatprep.subr.bf16.mxu0 %v1262_v0 }
 0x8d7   :  { %1145 = vmatpush3.bf16.msra.mxu0 %v1183_v27 }
 0x8d8   :  { %1146 = vmatprep.subr.bf16.mxu0 %v1262_v0 }
 0x8db   :  { %1147 = vmatpush3.bf16.msra.mxu0 %v1184_v28 }
 0x8dc   :  { %1148 = vmatprep.subr.bf16.mxu0 %v1262_v0 }
 0x8df   :  { %1149 = vmatpush3.bf16.msra.mxu0 %v1185_v37 }
 0x8e0   :  { %1150 = vmatprep.subr.bf16.mxu0 %v1262_v0  ;;  %v1264_v0 = vmov 1.0|1.0  }
 0x8e3   :  { %1151 = vmatpush3.bf16.msra.mxu0 %v1186_v26 }
 0x999   :  { %v774_v30 = vpop.f32.mrb[12].mxu0 }
 0x99a   :  { %v775_v31 = vadd.f32 %v774_v30, %v724_v29  ;;  %v1126_v32 = vpop.f32.mrb[13].mxu0 }
 0x99b   :  { %v777_v33 = vpop.f32.mrb[14].mxu0 }
 0x99c   :  { %v780_v34 = vmax.f32 %v775_v31, 0.0  ;;  %v1127_v35 = vpop.f32.mrb[15].mxu0 }
 0x99e   :  { %v781_v36 = vpack.c.bf16 %v780_v34, %v780_v34 }
 0x9a0   :  { %1133 = vmatmul.mubr.msk.bf16.vlgmr.msra.gmra.mrb[28].mxu1 %vm229_vm6, %v781_v36 }
 0xa73   :  { %v839_v39 = vpop.f32.mrb[28].mxu1 }
 0xa74   :  { %v840_v19 = vadd.f32 %v839_v39, %v789_v38  ;;  %v1134_v42 = vpop.f32.mrb[29].mxu1 }
 0xa75   :  { %v842_v43 = vpop.f32.mrb[30].mxu1 }
 0xa76   :  { %v846_v44 = vadd.f32 %v845_v41, %v840_v19  ;;  %v1135_v45 = vpop.f32.mrb[31].mxu1 }
 0xa78   :  { %vm847_vm13 = vcmp.ge.f32.partialorder %v846_v44, 0.0 }
 0xa79   :  { %vm1008_vm14 = vmpackc.low %vm847_vm13, %vm847_vm13 }
 0xa7a   :  { %1153 = vmatmul.mubr.msk.bf16.vlgmr.msra.gmra.mrb[16].mxu0 %vm1008_vm14, %v1264_v0 }
 0xb4d   :  { %v948_v17 = vpop.f32.mrb[16].mxu0 }
 0xb4e   :  { %954 = vst [vmem:[#allocation7] sm:$0x3] %v948_v17  ;;  %v1154_v40 = vpop.f32.mrb[17].mxu0 }
 0xb4f   :  { %v951_v46 = vpop.f32.mrb[18].mxu0 }
 0xb50   :  { %1243 = shalt.err (!%p1240_p6)
}
 0xb51   :  { %s1244_s20 = scalar_lea.hbm %s1585_s13, 32 }
 0xb52   :  { %p1245_p7 = scmp.ne.s32.totalorder %s1585_s13, %s1244_s20  ;;  %p1248_p8 = scmp.lt.u32.totalorder %s1244_s20, %s1585_s13 }
 0xb54   :  { %p1250_p9 = pnand %p1248_p8, %p1245_p7 }
 0xb56   :  { %1253 = shalt.err (!%p1250_p9)
}
 0xb57   :  { %964 = dma.vmem_to_hbm [thread:$0]  %s962_s5, 32, %s1585_s13, [#allocation4]   ;;  %v1155_v47 = vpop.f32.mrb[19].mxu0 }
 0xb58   :  { %1258 = dma.done.wait [#allocation4], 32  }
 0xb59   :  { %1259 = vsyncadd [#allocation4], 4294967264 }
 0xb5a   :  { %968 = vsyncpa [#allocation3], 1 }
 0xb5b   :  { %969 = vsyncpa [#allocation6], 1 }
 0xb5c   :  { %970 = vsyncpa [#allocation4], 1 }

</bundles_post_ra>
